<compile_context>
chip_gen: v7x
topology: tpu7x:2x2x1
jax: 0.10.0
libtpu: 0.0.40
codegen_flags: <defaults>
</compile_context>

<pallas_src>
import jax
import jax.numpy as jnp
from jax.experimental import pallas as pl
from jax.experimental.pallas import tpu as pltpu


# ---------------------------------------------------------------------------
# Kernel
# ---------------------------------------------------------------------------
def _swish_math(x):
    # x * sigmoid(x) == x * (0.5 * tanh(0.5 * x) + 0.5): exactly one EUP op.
    half = jnp.asarray(0.5, dtype=x.dtype)
    return x * (half * jnp.tanh(half * x) + half)


def _swish_kernel(x_ref, o_ref):
    o_ref[...] = _swish_math(x_ref[...])


# ---------------------------------------------------------------------------
# Blocking / VMEM policy
# ---------------------------------------------------------------------------
_LANE_CANDIDATES = (4096, 2048, 1024, 512, 256, 128)
# Packed sublane multiple per itemsize: f32 -> 8 rows, bf16 -> 16, int8/fp8 -> 32.
_SUBLANE_BY_ITEMSIZE = {4: 8, 2: 16, 1: 32}
_MAX_BLOCK_BYTES = 8 * 1024 * 1024  # per pipelined buffer


def _vmem_limit_bytes() -> int:
    """Generation-aware scoped-VMEM budget (conservative default = v7x 64 MiB)."""
    cap = 64 * 1024 * 1024
    try:
        info = pltpu.get_tpu_info()
        cap = int(getattr(info, "vmem_capacity_bytes", cap))
    except Exception:
        pass
    # Leave headroom for compiler-internal scratch; never ask for more than 96 MiB.
    return min(cap * 3 // 4, 96 * 1024 * 1024)


def _choose_block_rows(rows: int, width: int, itemsize: int,
                       target_block_bytes: int) -> int:
    sublane = _SUBLANE_BY_ITEMSIZE.get(itemsize, 8)
    row_bytes = width * itemsize
    target_rows = max(sublane,
                      (target_block_bytes // row_bytes) // sublane * sublane)

    if rows < 2 * sublane:
        # Too small to split into two legal blocks: one full-dim block (always legal).
        return rows

    # Balanced split with at least 2 steps (megacore sharding on v7x).
    n_steps = max(2, pl.cdiv(rows, target_rows))
    block_rows = pl.cdiv(pl.cdiv(rows, n_steps), sublane) * sublane
    if block_rows >= rows:
        return rows
    return block_rows


def _swish_2d(x2d: jax.Array) -> jax.Array:
    rows, width = x2d.shape
    itemsize = jnp.dtype(x2d.dtype).itemsize
    n_elems = rows * width

    vmem_limit = _vmem_limit_bytes()
    # 2 inputs-in-flight + 2 outputs-in-flight per block + headroom.
    target_block_bytes = min(_MAX_BLOCK_BYTES, vmem_limit // 5)
    block_rows = _choose_block_rows(rows, width, itemsize, target_block_bytes)
    grid = (pl.cdiv(rows, block_rows),)

    return pl.pallas_call(
        _swish_kernel,
        out_shape=jax.ShapeDtypeStruct((rows, width), x2d.dtype),
        grid_spec=pltpu.PrefetchScalarGridSpec(
            num_scalar_prefetch=0,
            grid=grid,
            in_specs=[pl.BlockSpec((block_rows, width), lambda i: (i, 0))],
            out_specs=pl.BlockSpec((block_rows, width), lambda i: (i, 0)),
        ),
        compiler_params=pltpu.CompilerParams(
            dimension_semantics=("parallel",),
            vmem_limit_bytes=vmem_limit,
        ),
        cost_estimate=pl.CostEstimate(
            flops=4 * n_elems,
            transcendentals=n_elems,
            bytes_accessed=2 * n_elems * itemsize,
        ),
    )(x2d)


# ---------------------------------------------------------------------------
# Public entry point
# ---------------------------------------------------------------------------
def swish(x: jax.Array) -> jax.Array:
    """Elementwise Swish: x * sigmoid(x). Same shape/dtype as input."""
    orig_shape = x.shape
    n = x.size

    # Fast path: widest lane-dense last dim that divides the flat size exactly.
    for w in _LANE_CANDIDATES:
        if n % w == 0:
            y2d = _swish_2d(x.reshape(n // w, w))
            return y2d.reshape(orig_shape)

    # Fallback (flat size not a multiple of 128): run the kernel on the
    # lane-aligned prefix; handle the <128-element tail with plain jnp.
    # No padded full-array copy, no trailing slice pass.
    n_main = (n // 128) * 128
    if n_main == 0:
        return _swish_math(x)  # tiny tensor: plain jnp is already optimal

    x_flat = x.reshape(-1)
    width = 128
    for w in _LANE_CANDIDATES:
        if n_main % w == 0:
            width = w
            break
    y_main = _swish_2d(x_flat[:n_main].reshape(n_main // width, width)).reshape(-1)
    y_tail = _swish_math(x_flat[n_main:])
    return jnp.concatenate([y_main, y_tail]).reshape(orig_shape)


def swish_ref(x):
    return x * jax.nn.sigmoid(x)


# ---------------------------------------------------------------------------
# Self-test
# ---------------------------------------------------------------------------
if __name__ == "__main__":
    key = jax.random.PRNGKey(0)

    # Small NCHW input consistent with typical conv-net usage of Swish.
    x = jax.random.normal(key, (2, 4, 16, 16), dtype=jnp.float32)
    y = swish(x)
    jax.block_until_ready(y)
    assert y.shape == x.shape and y.dtype == x.dtype
    assert jnp.allclose(y, swish_ref(x), atol=1e-5, rtol=1e-5)

    # Slightly larger tensor: exercises the balanced multi-block grid path.
    x_big = jax.random.normal(jax.random.PRNGKey(2), (4, 16, 32, 32),
                              dtype=jnp.float32)
    y_big = swish(x_big)
    jax.block_until_ready(y_big)
    assert jnp.allclose(y_big, swish_ref(x_big), atol=1e-5, rtol=1e-5)

    # bf16 activations (dtype-aware sublane rounding path).
    x_bf16 = jax.random.normal(jax.random.PRNGKey(3), (2, 8, 16, 16),
                               dtype=jnp.bfloat16)
    y_bf16 = swish(x_bf16)
    jax.block_until_ready(y_bf16)
    assert y_bf16.dtype == jnp.bfloat16
    assert jnp.allclose(y_bf16.astype(jnp.float32),
                        swish_ref(x_bf16).astype(jnp.float32),
                        atol=2e-2, rtol=2e-2)

    # Non-multiple-of-128 fallback (tail handled with plain jnp, no pad pass).
    x_odd = jax.random.normal(jax.random.PRNGKey(1), (3, 5, 7), dtype=jnp.float32)
    y_odd = swish(x_odd)
    jax.block_until_ready(y_odd)
    assert y_odd.shape == x_odd.shape
    assert jnp.allclose(y_odd, swish_ref(x_odd), atol=1e-5, rtol=1e-5)

    print("KERNEL_OK")
</pallas_src>

<mosaic_0001>
module attributes {stable_mosaic.version = 11 : i64} {
  func.func @_swish_kernel(%arg0: i32, %arg1: memref<1x2048xf32, #tpu.memory_space<vmem>>, %arg2: memref<1x2048xf32, #tpu.memory_space<vmem>>) attributes {dimension_semantics = [#tpu.dimension_semantics<parallel>], iteration_bounds = array<i64: 1>, scalar_prefetch = 0 : i64, scratch_operands = 0 : i64, tpu.core_type = #tpu.core_type<tc>, window_params = [{transform_indices = @transform_0, window_bounds = array<i64: 1, 2048>}, {transform_indices = @transform_1, window_bounds = array<i64: 1, 2048>}]} {
    %c0 = arith.constant 0 : index
    %c0_0 = arith.constant 0 : index
    %0 = vector.load %arg1[%c0, %c0_0] : memref<1x2048xf32, #tpu.memory_space<vmem>>, vector<1x2048xf32>
    %cst = arith.constant 5.000000e-01 : f32
    %1 = vector.broadcast %cst : f32 to vector<1x2048xf32>
    %2 = arith.mulf %1, %0 : vector<1x2048xf32>
    %3 = math.tanh %2 : vector<1x2048xf32>
    %cst_1 = arith.constant 5.000000e-01 : f32
    %4 = vector.broadcast %cst_1 : f32 to vector<1x2048xf32>
    %5 = arith.mulf %4, %3 : vector<1x2048xf32>
    %cst_2 = arith.constant 5.000000e-01 : f32
    %6 = vector.broadcast %cst_2 : f32 to vector<1x2048xf32>
    %7 = arith.addf %5, %6 : vector<1x2048xf32>
    %8 = arith.mulf %0, %7 : vector<1x2048xf32>
    %c0_3 = arith.constant 0 : index
    %c0_4 = arith.constant 0 : index
    %9 = vector.load %arg2[%c0_3, %c0_4] : memref<1x2048xf32, #tpu.memory_space<vmem>>, vector<1x2048xf32>
    tpu.vector_store %arg2[%c0_3, %c0_4], %8 {strides = array<i32>} : memref<1x2048xf32, #tpu.memory_space<vmem>>, vector<1x2048xf32>,
    return
  }
  func.func @transform_0(%arg0: i32) -> (i32, i32) {
    %c0_i32 = arith.constant 0 : i32
    %c0_i32_0 = arith.constant 0 : i32
    return %arg0, %c0_i32 : i32, i32
  }
  func.func @transform_1(%arg0: i32) -> (i32, i32) {
    %c0_i32 = arith.constant 0 : i32
    %c0_i32_0 = arith.constant 0 : i32
    return %arg0, %c0_i32 : i32, i32
  }
}

</mosaic_0001>

<bundles_post_ra>
// kernel: tpu_custom_call.1
= control target key start
LH: loop header
LB: loop body
LE: loop exit
PB: predicated region body
PF: predicated region fallthrough
CT: control target
= control target key end

     0   :  { %6 = vsyncpa [#allocation3], 0  ;;  %s140_s0 = inlined_call_operand.hbm [shape: f32[1,2048], index: 0, kind: input, shape index: {}]   ;;  %s141_s1 = inlined_call_operand.hbm [shape: f32[1,2048], index: 1, kind: output, shape index: {}]  }
   0x1   :  { %7 = vsyncpa [#allocation4], 0  ;;  %s104_s6 = smov [#allocation2]   ;;  %s56_s10 = scalar_lea.hbm %s140_s0, 256 }
   0x2   :  { %s14_s7 = sshll.u32 %s104_s6, 4  ;;  %p57_p0 = scmp.ne.s32.totalorder %s140_s0, %s56_s10  ;;  %s15_s7 = int_to_ptr.vmem [resolvable:$true] %s14_s7 }
   0x3   :  { %p60_p1 = scmp.lt.u32.totalorder %s56_s10, %s140_s0 }
   0x5   :  { %p62_p2 = pnand %p60_p1, %p57_p0 }
   0x7   :  { %65 = shalt.err (!%p62_p2)
}
   0x8   :  { %s66_s15 = scalar_lea.vmem %s15_s7, 256  ;;  %p71_p4 = scmp.lt.s32.totalorder %s15_s7, %s15_s7 }
   0x9   :  { %p67_p3 = scmp.ne.s32.totalorder %s15_s7, %s66_s15  ;;  %p72_p5 = scmp.lt.s32.totalorder %s66_s15, %s66_s15 }
   0xb   :  { %p73_p6 = por %p72_p5, %p71_p4 }
   0xd   :  { %p74_p7 = pnand %p73_p6, %p67_p3 }
   0xf   :  { %77 = shalt.err (!%p74_p7)
}
  0x10   :  { %17 = dma.hbm_to_vmem [thread:$0]  %s140_s0, 256, %s15_s7, [#allocation3]  }
  0x11   :  { %100 = dma.done.wait [#allocation3], 256  }
  0x12   :  { %101 = vsyncadd [#allocation3], 4294967040  ;;  %v21_v0 = vld [vmem:[#allocation2] sm:$0xff]  ;;  %v22_v1 = vld [vmem:[#allocation2 + $0x8] sm:$0xff]  ;;  %s105_s18 = smov [#allocation5]  }
  0x13   :  { %v23_v2 = vmul.f32 0.5, %v21_v0  ;;  %v24_v3 = vmul.f32 0.5, %v22_v1  ;;  %s41_s19 = sshll.u32 %s105_s18, 4  ;;  %s42_s19 = int_to_ptr.vmem [resolvable:$true] %s41_s19 }
  0x14   :  { %s78_s0 = scalar_lea.vmem %s42_s19, 256  ;;  %p83_p9 = scmp.lt.s32.totalorder %s42_s19, %s42_s19 }
  0x15   :  { %52 = vtanh.f32 %v23_v2  ;;  %p79_p8 = scmp.ne.s32.totalorder %s42_s19, %s78_s0  ;;  %p84_p10 = scmp.lt.s32.totalorder %s78_s0, %s78_s0 }
  0x16   :  { %54 = vtanh.f32 %v24_v3 }
  0x17   :  { %p85_p11 = por %p84_p10, %p83_p9 }
  0x19   :  { %p86_p12 = pnand %p85_p11, %p79_p8 }
  0x1f   :  { %v53_v4 = vpop.eup %52 }
  0x20   :  { %v55_v5 = vpop.eup %54  ;;  %v27_v6 = vmul.f32 0.5, %v53_v4 }
  0x21   :  { %v28_v7 = vmul.f32 0.5, %v55_v5 }
  0x22   :  { %v29_v8 = vadd.f32 0.5, %v27_v6 }
  0x23   :  { %v30_v9 = vadd.f32 0.5, %v28_v7 }
  0x24   :  { %v31_v10 = vmul.f32 %v29_v8, %v21_v0 }
  0x25   :  { %v32_v11 = vmul.f32 %v30_v9, %v22_v1 }
  0x26   :  { %33 = vst [vmem:[#allocation5] sm:$0xff] %v31_v10 }
  0x27   :  { %34 = vst [vmem:[#allocation5 + $0x8] sm:$0xff] %v32_v11 }
  0x28   :  { %89 = shalt.err (!%p86_p12)
}
  0x29   :  { %s90_s22 = scalar_lea.hbm %s141_s1, 256 }
  0x2a   :  { %p91_p13 = scmp.ne.s32.totalorder %s141_s1, %s90_s22  ;;  %p94_p0 = scmp.lt.u32.totalorder %s90_s22, %s141_s1 }
  0x2c   :  { %p96_p1 = pnand %p94_p0, %p91_p13 }
  0x2e   :  { %99 = shalt.err (!%p96_p1)
}
  0x2f   :  { %44 = dma.vmem_to_hbm [thread:$0]  %s42_s19, 256, %s141_s1, [#allocation4]  }
  0x30   :  { %102 = dma.done.wait [#allocation4], 256  }
  0x31   :  { %103 = vsyncadd [#allocation4], 4294967040 }
  0x32   :  { %48 = vsyncpa [#allocation3], 1 }
  0x33   :  { %49 = vsyncpa [#allocation4], 1 }

</bundles_post_ra>
